<compile_context>
chip_gen: v6e
topology: v6e:2x2x1
jax: 0.10.0
libtpu: 0.0.40
codegen_flags: <defaults>
</compile_context>

<pallas_src>
import functools

import jax
import jax.numpy as jnp
from jax.experimental import pallas as pl
from jax.experimental.pallas import tpu as pltpu


def _round_up(x, mult):
    return -(-x // mult) * mult


def _ams_loss_kernel(logits_ref, numer_ref, out_ref, acc_ref, *,
                     m, n_true, last_tile_cols, mask_last_tile, mask_rows):
    i = pl.program_id(0)            # row-tile index   ("parallel")
    k = pl.program_id(1)            # class-tile index ("arbitrary", reduction)
    bn, bc = logits_ref.shape
    acc_w = acc_ref.shape[1]

    @pl.when(k == 0)
    def _init():
        acc_ref[...] = jnp.zeros_like(acc_ref)

    def accumulate(valid_cols):
        # Stream the class tile in <=128-lane strips; pure element-wise work
        # (VPU/EUP).  `valid_cols` is a trace-time int, so strip masking /
        # skipping is resolved statically.
        for off in range(0, bc, acc_w):
            if off >= valid_cols:
                break                                  # fully padded strips
            w = min(acc_w, bc - off)
            x = logits_ref[:, off:off + w].astype(jnp.float32)
            if off + w > valid_cols:                   # single straddling strip
                lane = jax.lax.broadcasted_iota(jnp.int32, (bn, w), 1)
                e = jnp.exp(jnp.where(lane < (valid_cols - off), x + m, -jnp.inf))
            else:
                e = jnp.exp(x + m)
            if w == acc_w:
                acc_ref[...] += e
            else:                                      # ragged tail (bc == C case)
                acc_ref[:, 0:w] += e

    if mask_last_tile:
        last = pl.num_programs(1) - 1

        @pl.when(k != last)
        def _interior():
            accumulate(bc)

        @pl.when(k == last)
        def _last():
            accumulate(last_tile_cols)
    else:
        accumulate(bc)

    @pl.when(k == pl.num_programs(1) - 1)
    def _finalize():
        total = jnp.sum(acc_ref[...], axis=1, keepdims=True)     # (bn, 1)
        numer = numer_ref[...]                                   # (bn, 1) f32
        if mask_rows:
            rows = i * bn + jax.lax.broadcasted_iota(jnp.int32, (bn, 1), 0)
            row_ok = rows < n_true
            # Sanitize padded rows BEFORE the log so no NaN/Inf is computed.
            total = jnp.where(row_ok, total, 1.0)
            numer = jnp.where(row_ok, numer, 0.0)
        # total includes the target column; subtract it back out once per row.
        excl_sum = total - jnp.exp(numer + m)     # sum_{j != t} exp(x_j + m)
        denom = jnp.exp(numer) + excl_sum
        L = numer - jnp.log(denom + 1e-10)
        if mask_rows:
            L = jnp.where(row_ok, L, 0.0)
        out_ref[...] = L


def ams_loss_v1(logits, targets, m=0.4, *, tile_n=256, tile_c=4096,
                min_row_tiles=2, vmem_limit_bytes=48 << 20):
    """logits: (N, C) f32/bf16, targets: (N,) int -> scalar f32 loss."""
    n, c = logits.shape
    targets = targets.astype(jnp.int32)

    # Numerator gathered on the XLA side: an N-element gather (negligible HBM)
    # that removes the target-column path from the kernel's hot loop entirely.
    numerator = jnp.take_along_axis(logits, targets[:, None],
                                    axis=1).astype(jnp.float32)      # (n, 1)

    # ---- Tile selection --------------------------------------------------
    # Row tile: multiple of 8 (or full extent); aim for >= min_row_tiles row
    # tiles so the "parallel" axis can be sharded across TensorCores (v7x).
    bn = min(_round_up(tile_n, 8), _round_up(pl.cdiv(n, min_row_tiles), 8))
    if bn >= n and n % 8 != 0:
        bn = n                       # tiny, non-8-multiple batch: full extent
    grid_n = pl.cdiv(n, bn)

    # Class tile: multiple of 128 (or full extent).  Default 4096 keeps the
    # double-buffered f32 footprint at ~8 MiB — inside the scoped VMEM budget
    # on v5e/v6e and well under v7x's 64 MiB physical VMEM.
    tile_c_aligned = _round_up(tile_c, 128)
    bc = c if c <= tile_c_aligned else tile_c_aligned
    grid_c = pl.cdiv(c, bc)

    acc_w = min(128, bc)
    mask_last_tile = (c % bc) != 0
    last_tile_cols = c - (grid_c - 1) * bc
    mask_rows = (n % bn) != 0

    kernel = functools.partial(
        _ams_loss_kernel, m=m, n_true=n,
        last_tile_cols=last_tile_cols, mask_last_tile=mask_last_tile,
        mask_rows=mask_rows)

    itemsize = jnp.dtype(logits.dtype).itemsize
    per_row = pl.pallas_call(
        kernel,
        out_shape=jax.ShapeDtypeStruct((grid_n * bn, 1), jnp.float32),
        grid_spec=pltpu.PrefetchScalarGridSpec(
            num_scalar_prefetch=0,
            grid=(grid_n, grid_c),
            in_specs=[
                pl.BlockSpec((bn, bc), lambda i, k: (i, k)),   # logits tile
                pl.BlockSpec((bn, 1), lambda i, k: (i, 0)),    # numerator col
            ],
            out_specs=pl.BlockSpec((bn, 1), lambda i, k: (i, 0)),
            scratch_shapes=[
                pltpu.VMEM((bn, acc_w), jnp.float32),   # running sum exp(x+m)
            ],
        ),
        compiler_params=pltpu.CompilerParams(
            dimension_semantics=("parallel", "arbitrary"),
            vmem_limit_bytes=vmem_limit_bytes,
        ),
        cost_estimate=pl.CostEstimate(
            flops=3 * n * c,
            transcendentals=n * c + 3 * n,
            bytes_accessed=n * c * itemsize + 2 * n * 4 + grid_n * bn * 4,
        ),
    )(logits, numerator)

    # Padded rows were written as 0 in-kernel; divide by the true N.
    return -jnp.sum(per_row) / n


def ams_loss_v1_ref(logits, targets, m=0.4):
    """Pure-JAX reference mirroring the PyTorch code."""
    n, c = logits.shape
    logits = logits.astype(jnp.float32)
    numerator = logits[jnp.arange(n), targets]
    mask = jax.nn.one_hot(targets, c, dtype=bool)
    excl_sum = jnp.sum(jnp.where(mask, 0.0, jnp.exp(logits + m)), axis=1)
    denominator = jnp.exp(numerator) + excl_sum
    L = numerator - jnp.log(denominator + 1e-10)
    return -jnp.mean(L)


if __name__ == "__main__":
    key = jax.random.PRNGKey(0)
    k1, k2, k3, k4, k5, k6 = jax.random.split(key, 6)

    # Case 1: small, single-tile (batch of 8 samples, 16 classes).
    N, C = 8, 16
    logits = jax.random.normal(k1, (N, C), dtype=jnp.float32)
    targets = jax.random.randint(k2, (N,), 0, C, dtype=jnp.int32)
    loss = jax.block_until_ready(ams_loss_v1(logits, targets, m=0.4))
    ref = ams_loss_v1_ref(logits, targets, m=0.4)
    assert jnp.allclose(loss, ref, rtol=1e-5, atol=1e-5), (loss, ref)

    # Case 2: tiled/masked path with small tiles — partial last row tile AND
    # partial last class tile (exercises the straddling-strip lane mask).
    N2, C2 = 20, 300
    logits2 = jax.random.normal(k3, (N2, C2), dtype=jnp.float32)
    targets2 = jax.random.randint(k4, (N2,), 0, C2, dtype=jnp.int32)
    loss2 = jax.block_until_ready(
        ams_loss_v1(logits2, targets2, m=0.4, tile_n=8, tile_c=128))
    ref2 = ams_loss_v1_ref(logits2, targets2, m=0.4)
    assert jnp.allclose(loss2, ref2, rtol=1e-5, atol=1e-5), (loss2, ref2)

    # Case 2b: same shapes with default tiles — full-extent class tile with a
    # ragged (44-lane) tail strip and a partial row tile.
    loss2b = jax.block_until_ready(ams_loss_v1(logits2, targets2, m=0.4))
    assert jnp.allclose(loss2b, ref2, rtol=1e-5, atol=1e-5), (loss2b, ref2)

    # Case 3: bf16 logits (in-kernel cast path), >=2 row tiles.
    N3, C3 = 32, 640
    logits3 = jax.random.normal(k5, (N3, C3), dtype=jnp.bfloat16)
    targets3 = jax.random.randint(k6, (N3,), 0, C3, dtype=jnp.int32)
    loss3 = jax.block_until_ready(ams_loss_v1(logits3, targets3, m=0.4))
    ref3 = ams_loss_v1_ref(logits3, targets3, m=0.4)
    assert jnp.allclose(loss3, ref3, rtol=1e-4, atol=1e-5), (loss3, ref3)

    print("KERNEL_OK")
</pallas_src>

<mosaic_0001>
module attributes {stable_mosaic.version = 11 : i64} {
  func.func @_ams_loss_kernel(%arg0: i32, %arg1: i32, %arg2: memref<8x16xf32, #tpu.memory_space<vmem>>, %arg3: memref<8x1xf32, #tpu.memory_space<vmem>>, %arg4: memref<8x1xf32, #tpu.memory_space<vmem>>, %arg5: memref<8x16xf32, #tpu.memory_space<vmem>>) attributes {dimension_semantics = [#tpu.dimension_semantics<parallel>, #tpu.dimension_semantics<arbitrary>], iteration_bounds = array<i64: 1, 1>, scalar_prefetch = 0 : i64, scratch_operands = 1 : i64, tpu.core_type = #tpu.core_type<tc>, window_params = [{transform_indices = @transform_0, window_bounds = array<i64: 8, 16>}, {transform_indices = @transform_1, window_bounds = array<i64: 8, 1>}, {transform_indices = @transform_2, window_bounds = array<i64: 8, 1>}]} {
    %c0_i32 = arith.constant 0 : i32
    %0 = arith.cmpi eq, %arg1, %c0_i32 : i32
    %1 = arith.extui %0 : i1 to i32
    %c0_i32_0 = arith.constant 0 : i32
    %2 = arith.cmpi ne, %1, %c0_i32_0 : i32
    scf.if %2 {
      %cst_8 = arith.constant 0.000000e+00 : f32
      %13 = vector.broadcast %cst_8 : f32 to vector<8x16xf32>
      %c0_9 = arith.constant 0 : index
      %c0_10 = arith.constant 0 : index
      %14 = vector.load %arg5[%c0_9, %c0_10] : memref<8x16xf32, #tpu.memory_space<vmem>>, vector<8x16xf32>
      tpu.vector_store %arg5[%c0_9, %c0_10], %13 {strides = array<i32>} : memref<8x16xf32, #tpu.memory_space<vmem>>, vector<8x16xf32>,
    } else {
    }
    %c0 = arith.constant 0 : index
    %c0_1 = arith.constant 0 : index
    %3 = vector.load %arg2[%c0, %c0_1] : memref<8x16xf32, #tpu.memory_space<vmem>>, vector<8x16xf32>
    %cst = arith.constant 4.000000e-01 : f32
    %4 = vector.broadcast %cst : f32 to vector<8x16xf32>
    %5 = arith.addf %3, %4 : vector<8x16xf32>
    %6 = math.exp %5 : vector<8x16xf32>
    %c0_2 = arith.constant 0 : index
    %c0_3 = arith.constant 0 : index
    %7 = vector.load %arg5[%c0_2, %c0_3] : memref<8x16xf32, #tpu.memory_space<vmem>>, vector<8x16xf32>
    %8 = arith.addf %7, %6 : vector<8x16xf32>
    %c0_4 = arith.constant 0 : index
    %c0_5 = arith.constant 0 : index
    %9 = vector.load %arg5[%c0_4, %c0_5] : memref<8x16xf32, #tpu.memory_space<vmem>>, vector<8x16xf32>
    tpu.vector_store %arg5[%c0_4, %c0_5], %8 {strides = array<i32>} : memref<8x16xf32, #tpu.memory_space<vmem>>, vector<8x16xf32>,
    %c0_i32_6 = arith.constant 0 : i32
    %10 = arith.cmpi eq, %arg1, %c0_i32_6 : i32
    %11 = arith.extui %10 : i1 to i32
    %c0_i32_7 = arith.constant 0 : i32
    %12 = arith.cmpi ne, %11, %c0_i32_7 : i32
    scf.if %12 {
      %c0_8 = arith.constant 0 : index
      %c0_9 = arith.constant 0 : index
      %13 = vector.load %arg5[%c0_8, %c0_9] : memref<8x16xf32, #tpu.memory_space<vmem>>, vector<8x16xf32>
      %cst_10 = arith.constant dense<0.000000e+00> : vector<8xf32>
      %14 = vector.multi_reduction <add>, %13, %cst_10 [1] : vector<8x16xf32> to vector<8xf32>
      %15 = vector.shape_cast %14 : vector<8xf32> to vector<8x1xf32>
      %c0_11 = arith.constant 0 : index
      %c0_12 = arith.constant 0 : index
      %16 = vector.load %arg3[%c0_11, %c0_12] : memref<8x1xf32, #tpu.memory_space<vmem>>, vector<8x1xf32>
      %cst_13 = arith.constant 4.000000e-01 : f32
      %17 = vector.broadcast %cst_13 : f32 to vector<8x1xf32>
      %18 = arith.addf %16, %17 : vector<8x1xf32>
      %19 = math.exp %18 : vector<8x1xf32>
      %20 = arith.subf %15, %19 : vector<8x1xf32>
      %21 = math.exp %16 : vector<8x1xf32>
      %22 = arith.addf %21, %20 : vector<8x1xf32>
      %cst_14 = arith.constant 1.000000e-10 : f32
      %23 = vector.broadcast %cst_14 : f32 to vector<8x1xf32>
      %24 = arith.addf %22, %23 : vector<8x1xf32>
      %25 = math.log %24 : vector<8x1xf32>
      %26 = arith.subf %16, %25 : vector<8x1xf32>
      %c0_15 = arith.constant 0 : index
      %c0_16 = arith.constant 0 : index
      %27 = vector.load %arg4[%c0_15, %c0_16] : memref<8x1xf32, #tpu.memory_space<vmem>>, vector<8x1xf32>
      tpu.vector_store %arg4[%c0_15, %c0_16], %26 {strides = array<i32>} : memref<8x1xf32, #tpu.memory_space<vmem>>, vector<8x1xf32>,
    } else {
    }
    return
  }
  func.func @transform_0(%arg0: i32, %arg1: i32) -> (i32, i32) {
    %c0_i32 = arith.constant 0 : i32
    return %arg0, %arg1 : i32, i32
  }
  func.func @transform_1(%arg0: i32, %arg1: i32) -> (i32, i32) {
    %c0_i32 = arith.constant 0 : i32
    %c0_i32_0 = arith.constant 0 : i32
    return %arg0, %c0_i32 : i32, i32
  }
  func.func @transform_2(%arg0: i32, %arg1: i32) -> (i32, i32) {
    %c0_i32 = arith.constant 0 : i32
    %c0_i32_0 = arith.constant 0 : i32
    return %arg0, %c0_i32 : i32, i32
  }
}

</mosaic_0001>

<bundles_post_ra>
// kernel: tpu_custom_call.1
= control target key start
LH: loop header
LB: loop body
LE: loop exit
PB: predicated region body
PF: predicated region fallthrough
CT: control target
= control target key end

     0   :  { %vm15_vm0 = vcmask 130048   ;;  %v59_v0 = vmov 0.0   ;;  %vm44_vm1 = vcmask 7168   ;;  %s84_s0 = inlined_call_operand.vmem [shape: f32[8,16], index: 0, kind: input, shape index: {}]   ;;  %s85_s1 = inlined_call_operand.vmem [shape: f32[8,1], index: 1, kind: input, shape index: {}]   ;;  %s86_s2 = inlined_call_operand.vmem [shape: f32[8,1], index: 2, kind: output, shape index: {}]  }
   0x1   :  { %16 = vst.msk [vmem:[#allocation2] sm:$0xff] %vm15_vm0, %v59_v0  ;;  %v17_v1 = vld [vmem:[%s84_s0] sm:$0xff] }
   0x2   :  { %v18_v2 = vadd.f32 0.4, %v17_v1  ;;  %v32_v9 = vld [vmem:[%s85_s1] sm:$0xff] }
   0x3   :  { %v33_v10 = vadd.f32 0.4, %v32_v9  ;;  %v37_v12 = vmul.f32 1.442695, %v32_v9 }
   0x4   :  { %v19_v3 = vmul.f32 1.442695, %v18_v2 }
   0x5   :  { %v34_v11 = vmul.f32 1.442695, %v33_v10 }
   0x6   :  { %51 = vpow2.f32 %v19_v3 }
   0x7   :  { %53 = vpow2.f32 %v34_v11 }
   0x8   :  { %v21_v4 = vld [vmem:[#allocation2] sm:$0xff]  ;;  %55 = vpow2.f32 %v37_v12 }
  0x13   :  { %v52_v5 = vpop.eup %51 }
  0x14   :  { %v22_v6 = vadd.f32 %v52_v5, %v21_v4  ;;  %v54_v13 = vpop.eup %53 }
  0x15   :  { %v56_v14 = vpop.eup %55 }
  0x16   :  { %24 = vst.msk [vmem:[#allocation2] sm:$0xff] %vm15_vm0, %v22_v6 }
  0x1d   :  { %v28_v7 = vld [vmem:[#allocation2] sm:$0xff] }
  0x1e   :  { %v29_v8 = vsel %vm15_vm0, %v28_v7, 0.0 }
  0x1f   :  { %30 = vadd.xlane.f32.xlu0 %v29_v8 }
  0xa8   :  { %v31_v15 = vpop.xlane.xlu0 %30 }
  0xa9   :  { %v36_v16 = vsub.f32 %v31_v15, %v54_v13 }
  0xab   :  { %v39_v17 = vadd.f32 %v56_v14, %v36_v16 }
  0xad   :  { %v40_v18 = vadd.f32 1e-10, %v39_v17 }
  0xaf   :  { %57 = vlog2.f32 %v40_v18 }
  0xbc   :  { %v58_v19 = vpop.eup %57 }
  0xbd   :  { %v42_v20 = vmul.f32 0.6931472, %v58_v19 }
  0xbf   :  { %v43_v21 = vsub.f32 %v32_v9, %v42_v20 }
  0xc1   :  { %45 = vst.msk [vmem:[%s86_s2] sm:$0xff] %vm44_vm1, %v43_v21 }

</bundles_post_ra>
